<compile_context>
chip_gen: v7x
topology: tpu7x:2x2x1
jax: 0.10.0
libtpu: 0.0.40
codegen_flags: <defaults>
</compile_context>

<pallas_src>
import jax
import jax.numpy as jnp
from jax.experimental import pallas as pl
from jax.experimental.pallas import tpu as pltpu


_BLOCK_TARGET_BYTES = 4 << 20    # ~4 MiB input blocks saturate HBM with tiny VMEM
_SMALL_BLOCK_BYTES = 512 << 10   # below this, ask for 3-deep input buffering
_MIN_GRID_STEPS = 4              # keep the DMA pipeline busy when possible


def _round_up(x, m):
    return ((x + m - 1) // m) * m


def _sublane_multiple(dtype):
    # native sublane packing: 8 rows for 32-bit, 16 for 16-bit, 32 for 8-bit
    return {4: 8, 2: 16, 1: 32}.get(jnp.dtype(dtype).itemsize, 8)


def _num_tensorcores():
    try:
        info = pltpu.get_tpu_info()
        for attr in ("num_tensorcores", "tensorcore_count", "num_cores",
                     "cores_per_chip"):
            v = getattr(info, attr, None)
            if isinstance(v, int) and v > 0:
                return v
    except Exception:
        pass
    try:
        if "v7" in jax.devices()[0].device_kind.lower():
            return 2
    except Exception:
        pass
    return 1


def _vmem_limit_bytes():
    try:
        cap = int(pltpu.get_tpu_info().vmem_capacity_bytes)
    except Exception:
        cap = 64 << 20  # assume the smallest (v7x per-TC) VMEM
    # With <= 4 MiB blocks a huge scoped limit buys nothing; keep headroom
    # for compiler-internal scratch (critical on 64 MiB v7x VMEM).
    return int(min(cap // 2, 64 << 20))


def _make_sum_kernel(*, nr, r_rem, acc_dtype, use_scratch):
    """Sum over axis 1 of a (tb, tr, D) block, accumulated across grid axis 1."""

    def tile_sum(x_ref, mask_tail):
        x = x_ref[...]
        if mask_tail:
            # Only the last rule tile can extend past R; zero those rows.
            r_idx = jax.lax.broadcasted_iota(jnp.int32, (1, x.shape[1], 1), 1)
            x = jnp.where(r_idx < r_rem, x, jnp.zeros_like(x))
        return jnp.sum(x.astype(acc_dtype), axis=1)

    if nr == 1:
        # Single rule tile: no accumulator, no mask, direct lane-dense store.
        def kernel(x_ref, o_ref):
            o_ref[...] = tile_sum(x_ref, False).astype(o_ref.dtype)
        return kernel

    def body(x_ref, o_ref, acc_ref):
        k = pl.program_id(1)

        @pl.when(k == 0)
        def _():
            acc_ref[...] = jnp.zeros_like(acc_ref)

        if r_rem:
            # Tail mask only on the final rule step; steady state stays clean.
            @pl.when(k < nr - 1)
            def _():
                acc_ref[...] += tile_sum(x_ref, False)

            @pl.when(k == nr - 1)
            def _():
                acc_ref[...] += tile_sum(x_ref, True)
        else:
            acc_ref[...] += tile_sum(x_ref, False)

        if use_scratch:
            @pl.when(k == nr - 1)
            def _():
                o_ref[...] = acc_ref[...].astype(o_ref.dtype)

    if use_scratch:
        def kernel(x_ref, o_ref, acc_ref):
            body(x_ref, o_ref, acc_ref)
    else:
        # Resident output block (same block index for every k) IS the
        # accumulator; acc_dtype == output dtype in this configuration.
        def kernel(x_ref, o_ref):
            body(x_ref, o_ref, o_ref)
    return kernel


def anfis_output_single(x, *, tb=None, tr=None):
    """Pallas implementation of ANFISOutputSingle.forward: sum over dim=1."""
    if x.ndim < 2:
        raise ValueError("expected input of rank >= 2 (batch, rules, ...)")

    B, R = x.shape[0], x.shape[1]
    trailing = x.shape[2:]
    D = 1
    for d in trailing:
        D *= int(d)
    out_shape_final = (B,) + trailing

    if R == 0 or B == 0 or D == 0:
        return jnp.zeros(out_shape_final, dtype=x.dtype)

    xr = x.reshape(B, R, D)

    in_dtype = x.dtype
    in_bytes = jnp.dtype(in_dtype).itemsize
    if jnp.issubdtype(in_dtype, jnp.floating):
        acc_dtype = jnp.float32
    elif jnp.issubdtype(in_dtype, jnp.integer):
        # TODO(synk): torch.sum promotes integer inputs to int64; we accumulate
        # in int32 and keep the input dtype on the output (x64 usually off).
        acc_dtype = jnp.int32
    else:
        acc_dtype = in_dtype

    # ---- lane packing for narrow consequent dims (D < 128) ----
    lane_pack = 1
    R_eff, D_eff = R, D
    if D < 128 and 128 % D == 0:
        g = 128 // D
        if R % g == 0 and R >= g:
            lane_pack = g
            R_eff, D_eff = R // g, D * g
            xr = xr.reshape(B, R_eff, D_eff)   # contiguous reshape: free in HBM

    sub_in = _sublane_multiple(in_dtype)
    D_pad = _round_up(D_eff, 128)
    # padded bytes of one batch row at full rule extent
    row_bytes = _round_up(R_eff, sub_in) * D_pad * in_bytes

    # ---- tile selection: ~4 MiB blocks, several grid steps if possible ----
    if tr is None:
        if 8 * row_bytes <= _BLOCK_TARGET_BYTES:
            tr = R_eff                                   # keep reduction un-tiled
        else:
            tr = _BLOCK_TARGET_BYTES // (8 * D_pad * in_bytes)
            tr = max(sub_in, (tr // sub_in) * sub_in)
    tr = int(min(tr, R_eff))
    if tr < R_eff:
        tr = max(sub_in, (tr // sub_in) * sub_in)        # (8,128) + packing rule

    tr_pad = min(_round_up(tr, sub_in), _round_up(R_eff, sub_in))
    blk_row_bytes = tr_pad * D_pad * in_bytes            # padded per-batch-row bytes

    if tb is None:
        tb = max(8, ((_BLOCK_TARGET_BYTES // blk_row_bytes) // 8) * 8)
    tb = int(tb)
    if tb != B:
        tb = max(8, _round_up(min(tb, _round_up(B, 8)), 8))

    nb = pl.cdiv(B, tb)
    nr = pl.cdiv(R_eff, tr)

    # keep the pipeline busy: prefer several grid steps over one big tile
    while nb * nr < _MIN_GRID_STEPS and tb > 8:
        tb = max(8, ((tb // 2) // 8) * 8)
        nb = pl.cdiv(B, tb)

    # balance across TensorCores only if the chip actually has more than one
    cores = _num_tensorcores()
    if cores > 1 and B > 8 and (nb < cores or nb % cores != 0):
        target_nb = max(cores, _round_up(nb, cores))
        new_tb = max(8, _round_up(pl.cdiv(B, target_nb), 8))
        if new_tb < tb:
            tb = new_tb
            nb = pl.cdiv(B, tb)

    r_rem = R_eff % tr                       # valid rows of the last rule tile
    use_scratch = (nr > 1) and (jnp.dtype(acc_dtype) != jnp.dtype(in_dtype))

    kernel = _make_sum_kernel(nr=nr, r_rem=r_rem, acc_dtype=acc_dtype,
                              use_scratch=use_scratch)
    scratch_shapes = [pltpu.VMEM((tb, D_eff), acc_dtype)] if use_scratch else []

    cost = pl.CostEstimate(
        flops=B * R * D,
        transcendentals=0,
        bytes_accessed=B * R * D * in_bytes + B * D * in_bytes,
    )

    blk_bytes = tb * blk_row_bytes
    deep_pipeline = (blk_bytes < _SMALL_BLOCK_BYTES and nb * nr >= 4
                     and hasattr(pl, "Buffered"))

    def run(buffered):
        if buffered:
            in_spec = pl.BlockSpec((tb, tr, D_eff), lambda i, k: (i, k, 0),
                                   pipeline_mode=pl.Buffered(3))
        else:
            in_spec = pl.BlockSpec((tb, tr, D_eff), lambda i, k: (i, k, 0))
        return pl.pallas_call(
            kernel,
            out_shape=jax.ShapeDtypeStruct((B, D_eff), in_dtype),
            grid_spec=pltpu.PrefetchScalarGridSpec(
                num_scalar_prefetch=0,
                grid=(nb, nr),
                in_specs=[in_spec],
                out_specs=pl.BlockSpec((tb, D_eff), lambda i, k: (i, 0)),
                scratch_shapes=scratch_shapes,
            ),
            compiler_params=pltpu.CompilerParams(
                dimension_semantics=("parallel", "arbitrary"),
                vmem_limit_bytes=_vmem_limit_bytes(),
            ),
            cost_estimate=cost,
        )(xr)

    if deep_pipeline:
        try:
            out = run(True)
        except Exception:     # older jax or lowering without Buffered support
            out = run(False)
    else:
        out = run(False)

    if lane_pack > 1:
        # fold the lane-packed rule groups: tiny wrapper-side reduction
        out = (out.reshape(B, lane_pack, D).astype(acc_dtype)
               .sum(axis=1).astype(in_dtype))

    return out.reshape(out_shape_final)


class ANFISOutputSingle:
    """JAX/Pallas counterpart of the PyTorch module (parameter-free)."""

    def __init__(self, consequent_layer_size):
        self.consequent_layer_size = consequent_layer_size

    def __call__(self, x):
        return anfis_output_single(x)


if __name__ == "__main__":
    key = jax.random.PRNGKey(0)
    module = ANFISOutputSingle(consequent_layer_size=128)

    # 1) Canonical small ANFIS shapes: batch=8, rules=16, consequent dim=128.
    x1 = jax.random.normal(key, (8, 16, 128), dtype=jnp.float32)
    out1 = jax.block_until_ready(module(x1))
    ref1 = jnp.sum(x1, axis=1)
    assert out1.shape == ref1.shape and out1.dtype == ref1.dtype
    assert jnp.allclose(out1, ref1, atol=1e-5, rtol=1e-5)

    # 2) Narrow consequent dim (D=64 -> lane-packed) with awkward B / R.
    x2 = jax.random.normal(jax.random.PRNGKey(0), (12, 20, 64), dtype=jnp.float32)
    out2 = jax.block_until_ready(anfis_output_single(x2))
    ref2 = jnp.sum(x2, axis=1)
    assert out2.shape == ref2.shape
    assert jnp.allclose(out2, ref2, atol=1e-5, rtol=1e-5)

    # 3) bf16 with a tiled rule axis + tail (exercises the f32 scratch
    #    accumulator, the last-step tail mask and the deeper input pipeline).
    x3 = jax.random.normal(jax.random.PRNGKey(0), (16, 40, 128), dtype=jnp.bfloat16)
    out3 = jax.block_until_ready(anfis_output_single(x3, tb=8, tr=16))
    ref3 = jnp.sum(x3.astype(jnp.float32), axis=1)
    assert out3.shape == (16, 128) and out3.dtype == jnp.bfloat16
    assert jnp.allclose(out3.astype(jnp.float32), ref3, atol=2e-1, rtol=5e-2)

    # 4) f32 with a tiled rule axis (no scratch: the resident output block is
    #    the accumulator across the rule grid).
    x4 = jax.random.normal(jax.random.PRNGKey(0), (16, 64, 128), dtype=jnp.float32)
    out4 = jax.block_until_ready(anfis_output_single(x4, tb=8, tr=16))
    ref4 = jnp.sum(x4, axis=1)
    assert jnp.allclose(out4, ref4, atol=1e-4, rtol=1e-5)

    print("KERNEL_OK")
</pallas_src>

<mosaic_0001>
module attributes {stable_mosaic.version = 11 : i64} {
  func.func @kernel(%arg0: i32, %arg1: i32, %arg2: memref<8x16x128xf32, #tpu.memory_space<vmem>>, %arg3: memref<8x128xf32, #tpu.memory_space<vmem>>) attributes {dimension_semantics = [#tpu.dimension_semantics<parallel>, #tpu.dimension_semantics<arbitrary>], iteration_bounds = array<i64: 1, 1>, scalar_prefetch = 0 : i64, scratch_operands = 0 : i64, tpu.core_type = #tpu.core_type<tc>, window_params = [{transform_indices = @transform_0, window_bounds = array<i64: 8, 16, 128>}, {transform_indices = @transform_1, window_bounds = array<i64: 8, 128>}]} {
    %c0 = arith.constant 0 : index
    %c0_0 = arith.constant 0 : index
    %c0_1 = arith.constant 0 : index
    %0 = vector.load %arg2[%c0, %c0_0, %c0_1] : memref<8x16x128xf32, #tpu.memory_space<vmem>>, vector<8x16x128xf32>
    %cst = arith.constant dense<0.000000e+00> : vector<8x128xf32>
    %1 = vector.multi_reduction <add>, %0, %cst [1] : vector<8x16x128xf32> to vector<8x128xf32>
    %c0_2 = arith.constant 0 : index
    %c0_3 = arith.constant 0 : index
    %2 = vector.load %arg3[%c0_2, %c0_3] : memref<8x128xf32, #tpu.memory_space<vmem>>, vector<8x128xf32>
    tpu.vector_store %arg3[%c0_2, %c0_3], %1 {strides = array<i32>} : memref<8x128xf32, #tpu.memory_space<vmem>>, vector<8x128xf32>,
    return
  }
  func.func @transform_0(%arg0: i32, %arg1: i32) -> (i32, i32, i32) {
    %c0_i32 = arith.constant 0 : i32
    %c0_i32_0 = arith.constant 0 : i32
    return %arg0, %arg1, %c0_i32 : i32, i32, i32
  }
  func.func @transform_1(%arg0: i32, %arg1: i32) -> (i32, i32) {
    %c0_i32 = arith.constant 0 : i32
    %c0_i32_0 = arith.constant 0 : i32
    return %arg0, %c0_i32 : i32, i32
  }
}

</mosaic_0001>

<bundles_post_ra>
// kernel: tpu_custom_call.1
= control target key start
LH: loop header
LB: loop body
LE: loop exit
PB: predicated region body
PF: predicated region fallthrough
CT: control target
= control target key end

     0   :  { %6 = vsyncpa [#allocation3], 0  ;;  %s226_s0 = inlined_call_operand.hbm [shape: f32[8,16,128], index: 0, kind: input, shape index: {}]   ;;  %s227_s1 = inlined_call_operand.hbm [shape: f32[8,128], index: 1, kind: output, shape index: {}]  }
   0x1   :  { %7 = vsyncpa [#allocation4], 0  ;;  %s186_s6 = smov [#allocation2]   ;;  %s138_s10 = scalar_lea.hbm %s226_s0, 2048 }
   0x2   :  { %s13_s7 = sshll.u32 %s186_s6, 4  ;;  %p139_p0 = scmp.ne.s32.totalorder %s226_s0, %s138_s10  ;;  %s14_s7 = int_to_ptr.vmem [resolvable:$true] %s13_s7 }
   0x3   :  { %p142_p1 = scmp.lt.u32.totalorder %s138_s10, %s226_s0 }
   0x5   :  { %p144_p2 = pnand %p142_p1, %p139_p0 }
   0x7   :  { %147 = shalt.err (!%p144_p2)
}
   0x8   :  { %s148_s15 = scalar_lea.vmem %s14_s7, 2048  ;;  %p153_p4 = scmp.lt.s32.totalorder %s14_s7, %s14_s7 }
   0x9   :  { %p149_p3 = scmp.ne.s32.totalorder %s14_s7, %s148_s15  ;;  %p154_p5 = scmp.lt.s32.totalorder %s148_s15, %s148_s15 }
   0xb   :  { %p155_p6 = por %p154_p5, %p153_p4 }
   0xd   :  { %p156_p7 = pnand %p155_p6, %p149_p3 }
   0xf   :  { %159 = shalt.err (!%p156_p7)
}
  0x10   :  { %s187_s16 = smov 128   ;;  %s188_s17 = smov 8  }
  0x11   :  { %19 = dma.hbm_to_vmem [thread:$0]  %s226_s0, 2048, %s14_s7, [#allocation3], %s187_s16, %s187_s16, %s188_s17  }
  0x12   :  { %182 = dma.done.wait [#allocation3], 2048  }
  0x13   :  { %183 = vsyncadd [#allocation3], 4294965248  ;;  %v23_v0 = vld [vmem:[#allocation2] sm:$0xff]  ;;  %v24_v1 = vld [vmem:[#allocation2 + $0x8] sm:$0xff]  ;;  %vm103_vm0 = vcmask 1041409   ;;  %vm105_vm1 = vcmask 1042434  }
  0x14   :  { %v25_v2 = vld [vmem:[#allocation2 + $0x10] sm:$0xff]  ;;  %v26_v3 = vld [vmem:[#allocation2 + $0x18] sm:$0xff]  ;;  %v27_v4 = vld [vmem:[#allocation2 + $0x20] sm:$0xff]  ;;  %v39_v6 = vadd.f32 %v24_v1, %v23_v0  ;;  %vm107_vm2 = vcmask 1043459   ;;  %vm109_vm3 = vcmask 1044484   ;;  %vm111_vm4 = vcmask 1045509  }
  0x15   :  { %v28_v5 = vld [vmem:[#allocation2 + $0x28] sm:$0xff]  ;;  %v29_v7 = vld [vmem:[#allocation2 + $0x30] sm:$0xff]  ;;  %v30_v8 = vld [vmem:[#allocation2 + $0x38] sm:$0xff]  ;;  %v46_v10 = vadd.f32 %v26_v3, %v25_v2  ;;  %vm113_vm5 = vcmask 1046534   ;;  %s189_s0 = smov [#allocation5]   ;;  %vm115_vm6 = vcmask 1047559  }
  0x16   :  { %v31_v9 = vld [vmem:[#allocation2 + $0x40] sm:$0xff]  ;;  %v53_v11 = vadd.f32 %v28_v5, %v27_v4  ;;  %v32_v12 = vld [vmem:[#allocation2 + $0x48] sm:$0xff]  ;;  %v33_v13 = vld [vmem:[#allocation2 + $0x50] sm:$0xff]  ;;  %v40_v15 = vrot.slane %v39_v6, 4  ;;  %v60_v16 = vadd.f32 %v30_v8, %v29_v7  ;;  %s125_s20 = sshll.u32 %s189_s0, 4  ;;  %s126_s20 = int_to_ptr.vmem [resolvable:$true] %s125_s20 }
  0x17   :  { %v34_v14 = vld [vmem:[#allocation2 + $0x58] sm:$0xff]  ;;  %v35_v17 = vld [vmem:[#allocation2 + $0x60] sm:$0xff]  ;;  %v36_v18 = vld [vmem:[#allocation2 + $0x68] sm:$0xff]  ;;  %v47_v20 = vrot.slane %v46_v10, 4  ;;  %v67_v22 = vadd.f32 %v32_v12, %v31_v9  ;;  %s160_s21 = scalar_lea.vmem %s126_s20, 128  ;;  %p165_p9 = scmp.lt.s32.totalorder %s126_s20, %s126_s20 }
  0x18   :  { %v37_v19 = vld [vmem:[#allocation2 + $0x70] sm:$0xff]  ;;  %v54_v21 = vrot.slane %v53_v11, 4  ;;  %v74_v23 = vadd.f32 %v34_v14, %v33_v13  ;;  %v38_v24 = vld [vmem:[#allocation2 + $0x78] sm:$0xff]  ;;  %v41_v25 = vadd.f32 %v40_v15, %v39_v6  ;;  %v61_v26 = vrot.slane %v60_v16, 4  ;;  %p161_p8 = scmp.ne.s32.totalorder %s126_s20, %s160_s21  ;;  %p166_p10 = scmp.lt.s32.totalorder %s160_s21, %s160_s21 }
  0x19   :  { %v81_v27 = vadd.f32 %v36_v18, %v35_v17  ;;  %v48_v28 = vadd.f32 %v47_v20, %v46_v10  ;;  %v68_v30 = vrot.slane %v67_v22, 4  ;;  %v88_v35 = vadd.f32 %v38_v24, %v37_v19 }
  0x1a   :  { %v55_v29 = vadd.f32 %v54_v21, %v53_v11  ;;  %v75_v31 = vrot.slane %v74_v23, 4  ;;  %v42_v32 = vrot.slane %v41_v25, 2  ;;  %v62_v33 = vadd.f32 %v61_v26, %v60_v16  ;;  %p167_p11 = por %p166_p10, %p165_p9 }
  0x1b   :  { %v82_v34 = vrot.slane %v81_v27, 4  ;;  %v49_v36 = vrot.slane %v48_v28, 2  ;;  %v69_v38 = vadd.f32 %v68_v30, %v67_v22  ;;  %v89_v43 = vrot.slane %v88_v35, 4 }
  0x1c   :  { %v56_v37 = vrot.slane %v55_v29, 2  ;;  %v76_v39 = vadd.f32 %v75_v31, %v74_v23  ;;  %v43_v40 = vadd.f32 %v42_v32, %v41_v25  ;;  %v63_v41 = vrot.slane %v62_v33, 2  ;;  %p168_p12 = pnand %p167_p11, %p161_p8 }
  0x1d   :  { %v83_v42 = vadd.f32 %v82_v34, %v81_v27  ;;  %v50_v44 = vadd.f32 %v49_v36, %v48_v28  ;;  %v70_v46 = vrot.slane %v69_v38, 2  ;;  %v90_v51 = vadd.f32 %v89_v43, %v88_v35 }
  0x1e   :  { %v57_v45 = vadd.f32 %v56_v37, %v55_v29  ;;  %v77_v47 = vrot.slane %v76_v39, 2  ;;  %v44_v48 = vrot.slane %v43_v40, 1  ;;  %v64_v49 = vadd.f32 %v63_v41, %v62_v33 }
  0x1f   :  { %v84_v50 = vrot.slane %v83_v42, 2  ;;  %v51_v52 = vrot.slane %v50_v44, 1  ;;  %v71_v54 = vadd.f32 %v70_v46, %v69_v38  ;;  %v91_v59 = vrot.slane %v90_v51, 2 }
  0x20   :  { %v58_v53 = vrot.slane %v57_v45, 1  ;;  %v78_v55 = vadd.f32 %v77_v47, %v76_v39  ;;  %v45_v56 = vadd.f32 %v44_v48, %v43_v40  ;;  %v65_v57 = vrot.slane %v64_v49, 1 }
  0x21   :  { %v85_v58 = vadd.f32 %v84_v50, %v83_v42  ;;  %v52_v60 = vadd.f32 %v51_v52, %v50_v44  ;;  %v72_v62 = vrot.slane %v71_v54, 1  ;;  %v92_v2 = vadd.f32 %v91_v59, %v90_v51 }
  0x22   :  { %v59_v61 = vadd.f32 %v58_v53, %v57_v45  ;;  %v79_v63 = vrot.slane %v78_v55, 1  ;;  %v66_v0 = vadd.f32 %v65_v57, %v64_v49 }
  0x23   :  { %v86_v1 = vrot.slane %v85_v58, 1  ;;  %v73_v3 = vadd.f32 %v72_v62, %v71_v54  ;;  %v104_v5 = vsel %vm103_vm0, %v52_v60, %v45_v56  ;;  %v93_v7 = vrot.slane %v92_v2, 1 }
  0x24   :  { %v80_v4 = vadd.f32 %v79_v63, %v78_v55  ;;  %v106_v8 = vsel %vm105_vm1, %v59_v61, %v104_v5 }
  0x25   :  { %v87_v6 = vadd.f32 %v86_v1, %v85_v58  ;;  %v108_v9 = vsel %vm107_vm2, %v66_v0, %v106_v8  ;;  %v94_v10 = vadd.f32 %v93_v7, %v92_v2 }
  0x26   :  { %v110_v11 = vsel %vm109_vm3, %v73_v3, %v108_v9 }
  0x27   :  { %v112_v12 = vsel %vm111_vm4, %v80_v4, %v110_v11 }
  0x28   :  { %v114_v13 = vsel %vm113_vm5, %v87_v6, %v112_v12 }
  0x29   :  { %v116_v14 = vsel %vm115_vm6, %v94_v10, %v114_v13 }
  0x2a   :  { %118 = vst [vmem:[#allocation5] sm:$0xff] %v116_v14 }
  0x2b   :  { %171 = shalt.err (!%p168_p12)
}
  0x2c   :  { %s172_s24 = scalar_lea.hbm %s227_s1, 128 }
  0x2d   :  { %p173_p13 = scmp.ne.s32.totalorder %s227_s1, %s172_s24  ;;  %p176_p0 = scmp.lt.u32.totalorder %s172_s24, %s227_s1 }
  0x2f   :  { %p178_p1 = pnand %p176_p0, %p173_p13 }
  0x31   :  { %181 = shalt.err (!%p178_p1)
}
  0x32   :  { %128 = dma.vmem_to_hbm [thread:$0]  %s126_s20, 128, %s227_s1, [#allocation4]  }
  0x33   :  { %184 = dma.done.wait [#allocation4], 128  }
  0x34   :  { %185 = vsyncadd [#allocation4], 4294967168 }
  0x35   :  { %132 = vsyncpa [#allocation3], 1 }
  0x36   :  { %133 = vsyncpa [#allocation4], 1 }

</bundles_post_ra>
